<compile_context>
chip_gen: v7x
topology: tpu7x:2x2x1
jax: 0.10.0
libtpu: 0.0.40
codegen_flags: <defaults>
</compile_context>

<pallas_src>
import functools
import math

import jax
import jax.numpy as jnp
from jax.experimental import pallas as pl
from jax.experimental.pallas import tpu as pltpu

_VMEM_LIMIT_BYTES = 48 * 1024 * 1024


def _pick_tile(extent, target, align):
    """Largest tile <= target that is either the full extent or align-divisible."""
    if extent <= target:
        return int(extent)
    return int(max(align, (target // align) * align))


def _round_up(x, a):
    return ((x + a - 1) // a) * a


# ---------------------------------------------------------------------------
# Kernels
# ---------------------------------------------------------------------------
def _fused_update_norm_kernel(w_ref, x_ref, mean_ref, var_ref,
                              y_ref, new_mean_ref, new_var_ref,
                              new_std_ref, new_inv_ref,
                              *, decay, batch, demean, destd, clip):
    """One feature tile, full batch resident: compute stats, update running
    moments, and normalize from the resident slab (single HBM read of x)."""
    x = x_ref[...].astype(jnp.float32)                       # (m, td)
    inv_m = 1.0 / batch
    mean_x = jnp.sum(x, axis=0, keepdims=True) * inv_m       # (1, td)
    dev = x - mean_x
    var_x = jnp.sum(dev * dev, axis=0, keepdims=True) * inv_m

    w = w_ref[0]                                             # SMEM scalar
    old_mean = mean_ref[...]
    old_var = var_ref[...]

    var1 = (w * old_var + (1.0 - w) * var_x
            + w * (1.0 - w) * (mean_x - old_mean) ** 2)
    var2 = (1.0 - decay) * var_x + decay * var1
    var2 = jnp.maximum(var2, 0.0)                            # guard sqrt(-eps)
    mean1 = w * old_mean + (1.0 - w) * mean_x
    mean2 = (1.0 - decay) * mean_x + decay * mean1
    std = jnp.sqrt(var2)
    inv_std = 1.0 / (std + 1e-8)

    new_mean_ref[...] = mean2
    new_var_ref[...] = var2
    new_std_ref[...] = std
    new_inv_ref[...] = inv_std

    y = x
    if demean:
        y = y - mean2
    if destd:
        y = y * inv_std
    if clip:  # clip == 0.0 means "no clipping" (matches the torch reference)
        y = jnp.clip(y, -clip, clip)
    y_ref[...] = y.astype(y_ref.dtype)


def _update_kernel(w_ref, x_ref, mean_ref, var_ref,
                   new_mean_ref, new_var_ref, new_std_ref, new_inv_ref,
                   mean_acc, m2_acc, *, decay, batch, tm):
    """Tiled running-moment update (torch.var_mean(..., unbiased=False) semantics).

    grid = (dim_tiles, batch_tiles); program_id(1) is the batch reduction axis.
    """
    i = pl.program_id(1)

    @pl.when(i == 0)
    def _():
        mean_acc[...] = jnp.zeros_like(mean_acc)
        m2_acc[...] = jnp.zeros_like(m2_acc)

    x = x_ref[...].astype(jnp.float32)                       # (tm, td)

    ragged = (batch % tm) != 0                               # static
    if ragged:
        # Mask rows past the true batch size in the last tile (keeps OOB garbage
        # out of the accumulators).
        row = jax.lax.broadcasted_iota(jnp.int32, (tm, 1), 0) + i * tm
        valid = row < batch                                  # (tm, 1)
        x = jnp.where(valid, x, 0.0)
        cnt = jnp.minimum(tm, batch - i * tm).astype(jnp.float32)
    else:
        cnt = float(tm)

    count_b = (i * tm).astype(jnp.float32)                   # rows merged so far
    count_new = count_b + cnt

    sum_tile = jnp.sum(x, axis=0, keepdims=True)
    mean_tile = sum_tile / cnt
    dev = x - mean_tile
    if ragged:
        dev = jnp.where(valid, dev, 0.0)
    m2_tile = jnp.sum(dev * dev, axis=0, keepdims=True)

    # Chan's parallel-variance merge.
    mean_prev = mean_acc[...]
    delta = mean_tile - mean_prev
    mean_cur = mean_prev + delta * (cnt / count_new)
    m2_cur = m2_acc[...] + m2_tile + (delta * delta) * (count_b * cnt / count_new)
    mean_acc[...] = mean_cur
    m2_acc[...] = m2_cur

    @pl.when(i == pl.num_programs(1) - 1)
    def _():
        mean_x = mean_cur
        var_x = m2_cur * (1.0 / batch)                        # biased variance
        w = w_ref[0]                                          # SMEM scalar
        old_mean = mean_ref[...]
        old_var = var_ref[...]

        var1 = (w * old_var + (1.0 - w) * var_x
                + w * (1.0 - w) * (mean_x - old_mean) ** 2)
        var2 = (1.0 - decay) * var_x + decay * var1
        var2 = jnp.maximum(var2, 0.0)
        mean1 = w * old_mean + (1.0 - w) * mean_x
        mean2 = (1.0 - decay) * mean_x + decay * mean1
        std = jnp.sqrt(var2)

        new_mean_ref[...] = mean2
        new_var_ref[...] = var2
        new_std_ref[...] = std
        new_inv_ref[...] = 1.0 / (std + 1e-8)


def _normalize_kernel(x_ref, mean_ref, inv_ref, o_ref, *, demean, destd, clip):
    """Elementwise normalize + clamp (multiply by precomputed reciprocal)."""
    x = x_ref[...].astype(jnp.float32)
    if demean:
        x = x - mean_ref[...]
    if destd:
        x = x * inv_ref[...]
    if clip:
        x = jnp.clip(x, -clip, clip)
    o_ref[...] = x.astype(o_ref.dtype)


# ---------------------------------------------------------------------------
# Cached pallas_call builders (no per-step re-tracing)
# ---------------------------------------------------------------------------
@functools.lru_cache(maxsize=None)
def _get_fused_call(m, d, td, out_dtype, demean, destd, clip, decay):
    n_dt = pl.cdiv(d, td)
    kern = functools.partial(_fused_update_norm_kernel, decay=decay, batch=m,
                             demean=demean, destd=destd, clip=clip)
    stat_spec = pl.BlockSpec((1, td), lambda j: (0, j))
    call = pl.pallas_call(
        kern,
        out_shape=(jax.ShapeDtypeStruct((m, d), jnp.dtype(out_dtype)),
                   jax.ShapeDtypeStruct((1, d), jnp.float32),
                   jax.ShapeDtypeStruct((1, d), jnp.float32),
                   jax.ShapeDtypeStruct((1, d), jnp.float32),
                   jax.ShapeDtypeStruct((1, d), jnp.float32)),
        grid=(n_dt,),
        in_specs=[
            pl.BlockSpec(memory_space=pltpu.MemorySpace.SMEM),     # w scalar
            pl.BlockSpec((m, td), lambda j: (0, j)),               # x batch-slab
            stat_spec,                                             # running mean
            stat_spec,                                             # running var
        ],
        out_specs=(pl.BlockSpec((m, td), lambda j: (0, j)),        # y
                   stat_spec, stat_spec, stat_spec, stat_spec),
        compiler_params=pltpu.CompilerParams(
            dimension_semantics=("parallel",),
            vmem_limit_bytes=_VMEM_LIMIT_BYTES),
    )
    return jax.jit(call)


@functools.lru_cache(maxsize=None)
def _get_update_call(m, d, tm, td, decay):
    n_bt = pl.cdiv(m, tm)
    n_dt = pl.cdiv(d, td)
    kern = functools.partial(_update_kernel, decay=decay, batch=m, tm=tm)
    stat_spec = pl.BlockSpec((1, td), lambda j, i: (0, j))
    call = pl.pallas_call(
        kern,
        out_shape=(jax.ShapeDtypeStruct((1, d), jnp.float32),) * 4,
        grid=(n_dt, n_bt),                                   # reduction axis last
        in_specs=[
            pl.BlockSpec(memory_space=pltpu.MemorySpace.SMEM),     # w scalar
            pl.BlockSpec((tm, td), lambda j, i: (i, j)),           # x
            stat_spec, stat_spec,                                  # mean, var
        ],
        out_specs=(stat_spec,) * 4,
        scratch_shapes=[pltpu.VMEM((1, td), jnp.float32),    # mean accumulator
                        pltpu.VMEM((1, td), jnp.float32)],   # M2 accumulator
        compiler_params=pltpu.CompilerParams(
            dimension_semantics=("parallel", "arbitrary"),
            vmem_limit_bytes=_VMEM_LIMIT_BYTES),
    )
    return jax.jit(call)


@functools.lru_cache(maxsize=None)
def _get_normalize_call(m, d, tm, td, out_dtype, demean, destd, clip):
    kern = functools.partial(_normalize_kernel, demean=demean, destd=destd,
                             clip=clip)
    call = pl.pallas_call(
        kern,
        out_shape=jax.ShapeDtypeStruct((m, d), jnp.dtype(out_dtype)),
        grid=(pl.cdiv(m, tm), pl.cdiv(d, td)),
        in_specs=[
            pl.BlockSpec((tm, td), lambda i, j: (i, j)),     # x
            pl.BlockSpec((1, td), lambda i, j: (0, j)),      # mean
            pl.BlockSpec((1, td), lambda i, j: (0, j)),      # 1/(std+eps)
        ],
        out_specs=pl.BlockSpec((tm, td), lambda i, j: (i, j)),
        compiler_params=pltpu.CompilerParams(
            dimension_semantics=("parallel", "parallel"),
            vmem_limit_bytes=_VMEM_LIMIT_BYTES),
    )
    return jax.jit(call)


# ---------------------------------------------------------------------------
# Wrapper (plain-Python glue + state handling)
# ---------------------------------------------------------------------------
class RunningNorm:
    def __init__(self, dim, demean=True, destd=True, clip=5.0, decay=1.0,
                 tile_batch=1024, tile_dim=2048, fused_slab_bytes=8 << 20):
        self.dim = dim
        self.demean = bool(demean)
        self.destd = bool(destd)
        self.clip = float(clip) if clip else 0.0
        self.decay = float(decay)
        self.tile_batch = tile_batch
        self.tile_dim = tile_dim
        self.fused_slab_bytes = fused_slab_bytes
        self.n = 0                                  # host-side counter (torch: long buffer)
        self.mean = jnp.zeros((1, dim), jnp.float32)
        self.var = jnp.zeros((1, dim), jnp.float32)
        self.std = jnp.zeros((1, dim), jnp.float32)
        self.inv_std = jnp.zeros((1, dim), jnp.float32)

    # -- helpers ---------------------------------------------------------------
    def _split_dim_tile(self, d, td):
        """Ensure >= 2 'parallel' grid steps on the feature axis when d allows
        (keeps v7x's second TensorCore busy)."""
        if pl.cdiv(d, td) == 1 and d >= 256:
            td = _round_up((d + 1) // 2, 128)
        return int(td)

    def _fused_dim_tile(self, m, d):
        """Largest feature tile whose (m, td) x-slab fits the fused-path VMEM
        budget.  Returns None when the slab cannot fit even minimally."""
        td_max = (self.fused_slab_bytes // 4) // max(m, 1)
        if td_max >= d:
            td = d
        elif td_max >= 128:
            td = (td_max // 128) * 128
        else:
            return None
        return self._split_dim_tile(d, min(td, d))

    # -- two-pass fallback: running-statistics update --------------------------
    def _update_two_pass(self, x, w_arr):
        m, d = x.shape
        tm = _pick_tile(m, self.tile_batch, 8)
        td = _pick_tile(d, self.tile_dim, 128)
        td = self._split_dim_tile(d, td)
        call = _get_update_call(m, d, tm, td, self.decay)
        self.mean, self.var, self.std, self.inv_std = call(
            w_arr, x, self.mean, self.var)

    # -- normalize (eval path / fallback) ---------------------------------------
    def _normalize(self, x):
        m, d = x.shape
        mean, inv = self.mean, self.inv_std
        # Lane-dense output trick: fold batch rows into lanes when d is not a
        # multiple of 128 so stores are unmasked full-width vst.
        r = 1
        if d % 128 != 0 and m > 1:
            r_req = 128 // math.gcd(d, 128)
            if r_req > 1 and m % r_req == 0:
                r = r_req
        if r > 1:
            xf = x.reshape(m // r, r * d)
            meanf = jnp.tile(mean, (1, r))
            invf = jnp.tile(inv, (1, r))
            mm, dd = m // r, r * d
        else:
            xf, meanf, invf = x, mean, inv
            mm, dd = m, d
        tm = _pick_tile(mm, self.tile_batch, 8)
        td = _pick_tile(dd, self.tile_dim, 128)
        call = _get_normalize_call(mm, dd, tm, td, jnp.dtype(x.dtype).name,
                                   self.demean, self.destd, self.clip)
        y = call(xf, meanf, invf)
        return y.reshape(m, d) if r > 1 else y

    # -- forward ----------------------------------------------------------------
    def __call__(self, x, training=True):
        m, d = x.shape
        assert d == self.dim
        if training and m > 0:
            w_arr = jnp.full((1,), self.n / float(m + self.n), jnp.float32)
            td = self._fused_dim_tile(m, d)
            if td is not None:
                # Fused update + normalize: single HBM read of x.
                # TODO(synk): for d < 128 the fused output is still a narrow
                # (masked) store; folding inside the fused kernel would require
                # in-kernel cross-lane group reductions.
                call = _get_fused_call(m, d, td, jnp.dtype(x.dtype).name,
                                       self.demean, self.destd, self.clip,
                                       self.decay)
                y, self.mean, self.var, self.std, self.inv_std = call(
                    w_arr, x, self.mean, self.var)
                self.n += m
                return y
            # Slab too large for VMEM: separate update + normalize passes.
            self._update_two_pass(x, w_arr)
            self.n += m
            return self._normalize(x)
        if self.n > 0:
            return self._normalize(x)
        return x


# ---------------------------------------------------------------------------
# Pure-JAX reference for verification
# ---------------------------------------------------------------------------
def _ref_step(x, n, mean, var, demean, destd, clip, decay):
    mean_x = jnp.mean(x, axis=0)
    var_x = jnp.mean((x - mean_x) ** 2, axis=0)
    m = x.shape[0]
    w = n / float(m + n)
    var1 = w * var + (1 - w) * var_x + w * (1 - w) * (mean_x - mean) ** 2
    var2 = (1 - decay) * var_x + decay * var1
    mean1 = w * mean + (1 - w) * mean_x
    mean2 = (1 - decay) * mean_x + decay * mean1
    std = jnp.sqrt(var2)
    y = x
    if demean:
        y = y - mean2
    if destd:
        y = y / (std + 1e-8)
    if clip:
        y = jnp.clip(y, -clip, clip)
    return y, n + m, mean2, var2


if __name__ == "__main__":
    dim, batch = 32, 8
    key = jax.random.PRNGKey(0)
    k1, k2, k3, k4 = jax.random.split(key, 4)
    x1 = jax.random.normal(k1, (batch, dim), dtype=jnp.float32) * 2.0 + 1.0
    x2 = jax.random.normal(k2, (batch, dim), dtype=jnp.float32) * 0.5 - 3.0

    # --- case 0: eval before any update -> passthrough -------------------------
    rn0 = RunningNorm(dim)
    y0 = rn0(x1, training=False)
    assert jnp.allclose(y0, x1), "case 0 passthrough mismatch"

    # --- case A: fused training path, two steps (running update correctness) ---
    rn = RunningNorm(dim)
    y1 = rn(x1, training=True)
    y2 = rn(x2, training=True)
    jax.block_until_ready(y2)
    r1, n_r, mean_r, var_r = _ref_step(x1, 0, jnp.zeros(dim), jnp.zeros(dim),
                                       rn.demean, rn.destd, rn.clip, rn.decay)
    r2, _, mean_r2, var_r2 = _ref_step(x2, n_r, mean_r, var_r,
                                       rn.demean, rn.destd, rn.clip, rn.decay)
    assert jnp.allclose(y1, r1, atol=1e-5, rtol=1e-5), "case A step-1 mismatch"
    assert jnp.allclose(y2, r2, atol=1e-5, rtol=1e-5), "case A step-2 mismatch"

    # --- case A2: eval-mode normalize (folded lane-dense path, d=32 -> (m/4,128)) ---
    y_eval = rn(x1, training=False)
    jax.block_until_ready(y_eval)
    std_r2 = jnp.sqrt(var_r2)
    ye = jnp.clip((x1 - mean_r2) / (std_r2 + 1e-8), -rn.clip, rn.clip)
    assert jnp.allclose(y_eval, ye, atol=1e-5, rtol=1e-5), "case A2 eval mismatch"

    # --- case B: forced two-pass fallback, ragged multi-tile batch reduction ----
    xb = jax.random.normal(k3, (20, dim), dtype=jnp.float32) * 1.5 + 0.3
    rn_b = RunningNorm(dim, tile_batch=8, fused_slab_bytes=0)  # 3 batch tiles, last partial
    yb = rn_b(xb, training=True)
    jax.block_until_ready(yb)
    rb, _, _, _ = _ref_step(xb, 0, jnp.zeros(dim), jnp.zeros(dim),
                            rn_b.demean, rn_b.destd, rn_b.clip, rn_b.decay)
    assert jnp.allclose(yb, rb, atol=1e-5, rtol=1e-5), "case B mismatch"

    # --- case D: wide-dim fused path with the 2-way feature split (d=256) -------
    xd = jax.random.normal(k4, (16, 256), dtype=jnp.float32) * 0.7 - 1.2
    rn_d = RunningNorm(256)
    yd = rn_d(xd, training=True)
    jax.block_until_ready(yd)
    rd, _, _, _ = _ref_step(xd, 0, jnp.zeros(256), jnp.zeros(256),
                            rn_d.demean, rn_d.destd, rn_d.clip, rn_d.decay)
    assert jnp.allclose(yd, rd, atol=1e-5, rtol=1e-5), "case D mismatch"

    print("KERNEL_OK")
</pallas_src>

<mosaic_0001>
module attributes {stable_mosaic.version = 11 : i64} {
  func.func @_fused_update_norm_kernel(%arg0: i32, %arg1: memref<1xf32, #tpu.memory_space<smem>>, %arg2: memref<8x32xf32, #tpu.memory_space<vmem>>, %arg3: memref<1x32xf32, #tpu.memory_space<vmem>>, %arg4: memref<1x32xf32, #tpu.memory_space<vmem>>, %arg5: memref<8x32xf32, #tpu.memory_space<vmem>>, %arg6: memref<1x32xf32, #tpu.memory_space<vmem>>, %arg7: memref<1x32xf32, #tpu.memory_space<vmem>>, %arg8: memref<1x32xf32, #tpu.memory_space<vmem>>, %arg9: memref<1x32xf32, #tpu.memory_space<vmem>>) attributes {dimension_semantics = [#tpu.dimension_semantics<parallel>], iteration_bounds = array<i64: 1>, scalar_prefetch = 0 : i64, scratch_operands = 0 : i64, tpu.core_type = #tpu.core_type<tc>, window_params = [{transform_indices = @transform_0, window_bounds = array<i64: 1>}, {transform_indices = @transform_1, window_bounds = array<i64: 8, 32>}, {transform_indices = @transform_2, window_bounds = array<i64: 1, 32>}, {transform_indices = @transform_3, window_bounds = array<i64: 1, 32>}, {transform_indices = @transform_4, window_bounds = array<i64: 8, 32>}, {transform_indices = @transform_5, window_bounds = array<i64: 1, 32>}, {transform_indices = @transform_6, window_bounds = array<i64: 1, 32>}, {transform_indices = @transform_7, window_bounds = array<i64: 1, 32>}, {transform_indices = @transform_8, window_bounds = array<i64: 1, 32>}]} {
    %c0 = arith.constant 0 : index
    %c0_0 = arith.constant 0 : index
    %0 = vector.load %arg2[%c0, %c0_0] : memref<8x32xf32, #tpu.memory_space<vmem>>, vector<8x32xf32>
    %cst = arith.constant dense<0.000000e+00> : vector<32xf32>
    %1 = vector.multi_reduction <add>, %0, %cst [0] : vector<8x32xf32> to vector<32xf32>
    %2 = vector.shape_cast %1 : vector<32xf32> to vector<1x32xf32>
    %cst_1 = arith.constant 1.250000e-01 : f32
    %3 = vector.broadcast %cst_1 : f32 to vector<1x32xf32>
    %4 = arith.mulf %2, %3 : vector<1x32xf32>
    %5 = vector.broadcast %4 : vector<1x32xf32> to vector<8x32xf32>
    %6 = arith.subf %0, %5 : vector<8x32xf32>
    %7 = arith.mulf %6, %6 : vector<8x32xf32>
    %cst_2 = arith.constant dense<0.000000e+00> : vector<32xf32>
    %8 = vector.multi_reduction <add>, %7, %cst_2 [0] : vector<8x32xf32> to vector<32xf32>
    %9 = vector.shape_cast %8 : vector<32xf32> to vector<1x32xf32>
    %cst_3 = arith.constant 1.250000e-01 : f32
    %10 = vector.broadcast %cst_3 : f32 to vector<1x32xf32>
    %11 = arith.mulf %9, %10 : vector<1x32xf32>
    %c0_4 = arith.constant 0 : index
    %12 = memref.load %arg1[%c0_4] : memref<1xf32, #tpu.memory_space<smem>>
    %c0_5 = arith.constant 0 : index
    %c0_6 = arith.constant 0 : index
    %13 = vector.load %arg3[%c0_5, %c0_6] : memref<1x32xf32, #tpu.memory_space<vmem>>, vector<1x32xf32>
    %c0_7 = arith.constant 0 : index
    %c0_8 = arith.constant 0 : index
    %14 = vector.load %arg4[%c0_7, %c0_8] : memref<1x32xf32, #tpu.memory_space<vmem>>, vector<1x32xf32>
    %15 = vector.broadcast %12 : f32 to vector<1x32xf32>
    %16 = arith.mulf %15, %14 : vector<1x32xf32>
    %cst_9 = arith.constant 1.000000e+00 : f32
    %17 = arith.subf %cst_9, %12 : f32
    %18 = vector.broadcast %17 : f32 to vector<1x32xf32>
    %19 = arith.mulf %18, %11 : vector<1x32xf32>
    %20 = arith.addf %16, %19 : vector<1x32xf32>
    %cst_10 = arith.constant 1.000000e+00 : f32
    %21 = arith.subf %cst_10, %12 : f32
    %22 = arith.mulf %12, %21 : f32
    %23 = arith.subf %4, %13 : vector<1x32xf32>
    %24 = arith.mulf %23, %23 : vector<1x32xf32>
    %25 = vector.broadcast %22 : f32 to vector<1x32xf32>
    %26 = arith.mulf %25, %24 : vector<1x32xf32>
    %27 = arith.addf %20, %26 : vector<1x32xf32>
    %cst_11 = arith.constant 0.000000e+00 : f32
    %28 = vector.broadcast %cst_11 : f32 to vector<1x32xf32>
    %29 = arith.mulf %28, %11 : vector<1x32xf32>
    %cst_12 = arith.constant 1.000000e+00 : f32
    %30 = vector.broadcast %cst_12 : f32 to vector<1x32xf32>
    %31 = arith.mulf %30, %27 : vector<1x32xf32>
    %32 = arith.addf %29, %31 : vector<1x32xf32>
    %cst_13 = arith.constant 0.000000e+00 : f32
    %33 = vector.broadcast %cst_13 : f32 to vector<1x32xf32>
    %34 = arith.maximumf %32, %33 : vector<1x32xf32>
    %35 = vector.broadcast %12 : f32 to vector<1x32xf32>
    %36 = arith.mulf %35, %13 : vector<1x32xf32>
    %cst_14 = arith.constant 1.000000e+00 : f32
    %37 = arith.subf %cst_14, %12 : f32
    %38 = vector.broadcast %37 : f32 to vector<1x32xf32>
    %39 = arith.mulf %38, %4 : vector<1x32xf32>
    %40 = arith.addf %36, %39 : vector<1x32xf32>
    %cst_15 = arith.constant 0.000000e+00 : f32
    %41 = vector.broadcast %cst_15 : f32 to vector<1x32xf32>
    %42 = arith.mulf %41, %4 : vector<1x32xf32>
    %cst_16 = arith.constant 1.000000e+00 : f32
    %43 = vector.broadcast %cst_16 : f32 to vector<1x32xf32>
    %44 = arith.mulf %43, %40 : vector<1x32xf32>
    %45 = arith.addf %42, %44 : vector<1x32xf32>
    %46 = math.sqrt %34 : vector<1x32xf32>
    %cst_17 = arith.constant 9.99999993E-9 : f32
    %47 = vector.broadcast %cst_17 : f32 to vector<1x32xf32>
    %48 = arith.addf %46, %47 : vector<1x32xf32>
    %cst_18 = arith.constant 1.000000e+00 : f32
    %49 = vector.broadcast %cst_18 : f32 to vector<1x32xf32>
    %50 = arith.divf %49, %48 : vector<1x32xf32>
    %c0_19 = arith.constant 0 : index
    %c0_20 = arith.constant 0 : index
    %51 = vector.load %arg6[%c0_19, %c0_20] : memref<1x32xf32, #tpu.memory_space<vmem>>, vector<1x32xf32>
    tpu.vector_store %arg6[%c0_19, %c0_20], %45 {strides = array<i32>} : memref<1x32xf32, #tpu.memory_space<vmem>>, vector<1x32xf32>,
    %c0_21 = arith.constant 0 : index
    %c0_22 = arith.constant 0 : index
    %52 = vector.load %arg7[%c0_21, %c0_22] : memref<1x32xf32, #tpu.memory_space<vmem>>, vector<1x32xf32>
    tpu.vector_store %arg7[%c0_21, %c0_22], %34 {strides = array<i32>} : memref<1x32xf32, #tpu.memory_space<vmem>>, vector<1x32xf32>,
    %c0_23 = arith.constant 0 : index
    %c0_24 = arith.constant 0 : index
    %53 = vector.load %arg8[%c0_23, %c0_24] : memref<1x32xf32, #tpu.memory_space<vmem>>, vector<1x32xf32>
    tpu.vector_store %arg8[%c0_23, %c0_24], %46 {strides = array<i32>} : memref<1x32xf32, #tpu.memory_space<vmem>>, vector<1x32xf32>,
    %c0_25 = arith.constant 0 : index
    %c0_26 = arith.constant 0 : index
    %54 = vector.load %arg9[%c0_25, %c0_26] : memref<1x32xf32, #tpu.memory_space<vmem>>, vector<1x32xf32>
    tpu.vector_store %arg9[%c0_25, %c0_26], %50 {strides = array<i32>} : memref<1x32xf32, #tpu.memory_space<vmem>>, vector<1x32xf32>,
    %55 = vector.broadcast %45 : vector<1x32xf32> to vector<8x32xf32>
    %56 = arith.subf %0, %55 : vector<8x32xf32>
    %57 = vector.broadcast %50 : vector<1x32xf32> to vector<8x32xf32>
    %58 = arith.mulf %56, %57 : vector<8x32xf32>
    %cst_27 = arith.constant -5.000000e+00 : f32
    %cst_28 = arith.constant 5.000000e+00 : f32
    %59 = vector.broadcast %cst_27 : f32 to vector<8x32xf32>
    %60 = arith.maximumf %59, %58 : vector<8x32xf32>
    %61 = vector.broadcast %cst_28 : f32 to vector<8x32xf32>
    %62 = arith.minimumf %61, %60 : vector<8x32xf32>
    %c0_29 = arith.constant 0 : index
    %c0_30 = arith.constant 0 : index
    %63 = vector.load %arg5[%c0_29, %c0_30] : memref<8x32xf32, #tpu.memory_space<vmem>>, vector<8x32xf32>
    tpu.vector_store %arg5[%c0_29, %c0_30], %62 {strides = array<i32>} : memref<8x32xf32, #tpu.memory_space<vmem>>, vector<8x32xf32>,
    return
  }
  func.func @transform_0(%arg0: i32) -> i32 {
    %c0_i32 = arith.constant 0 : i32
    %c0_i32_0 = arith.constant 0 : i32
    return %c0_i32 : i32
  }
  func.func @transform_1(%arg0: i32) -> (i32, i32) {
    %c0_i32 = arith.constant 0 : i32
    %c0_i32_0 = arith.constant 0 : i32
    return %c0_i32, %arg0 : i32, i32
  }
  func.func @transform_2(%arg0: i32) -> (i32, i32) {
    %c0_i32 = arith.constant 0 : i32
    %c0_i32_0 = arith.constant 0 : i32
    return %c0_i32, %arg0 : i32, i32
  }
  func.func @transform_3(%arg0: i32) -> (i32, i32) {
    %c0_i32 = arith.constant 0 : i32
    %c0_i32_0 = arith.constant 0 : i32
    return %c0_i32, %arg0 : i32, i32
  }
  func.func @transform_4(%arg0: i32) -> (i32, i32) {
    %c0_i32 = arith.constant 0 : i32
    %c0_i32_0 = arith.constant 0 : i32
    return %c0_i32, %arg0 : i32, i32
  }
  func.func @transform_5(%arg0: i32) -> (i32, i32) {
    %c0_i32 = arith.constant 0 : i32
    %c0_i32_0 = arith.constant 0 : i32
    return %c0_i32, %arg0 : i32, i32
  }
  func.func @transform_6(%arg0: i32) -> (i32, i32) {
    %c0_i32 = arith.constant 0 : i32
    %c0_i32_0 = arith.constant 0 : i32
    return %c0_i32, %arg0 : i32, i32
  }
  func.func @transform_7(%arg0: i32) -> (i32, i32) {
    %c0_i32 = arith.constant 0 : i32
    %c0_i32_0 = arith.constant 0 : i32
    return %c0_i32, %arg0 : i32, i32
  }
  func.func @transform_8(%arg0: i32) -> (i32, i32) {
    %c0_i32 = arith.constant 0 : i32
    %c0_i32_0 = arith.constant 0 : i32
    return %c0_i32, %arg0 : i32, i32
  }
}

</mosaic_0001>

<bundles_post_ra>
// kernel: tpu_custom_call.1
= control target key start
LH: loop header
LB: loop body
LE: loop exit
PB: predicated region body
PF: predicated region fallthrough
CT: control target
= control target key end

     0   :  { %15 = vsyncpa [#allocation4], 0  ;;  %s491_s0 = inlined_call_operand.<no memory space> [shape: f32[1], index: 0, kind: input, shape index: {}]   ;;  %s492_s1 = inlined_call_operand.hbm [shape: f32[8,32], index: 1, kind: input, shape index: {}]   ;;  %s493_s2 = inlined_call_operand.vmem [shape: f32[1,32], index: 2, kind: input, shape index: {}]   ;;  %s494_s3 = inlined_call_operand.vmem [shape: f32[1,32], index: 3, kind: input, shape index: {}]   ;;  %s495_s4 = inlined_call_operand.hbm [shape: f32[8,32], index: 4, kind: output, shape index: {0}]   ;;  %s496_s5 = inlined_call_operand.hbm [shape: f32[1,32], index: 5, kind: output, shape index: {1}]   ;;  %s497_s6 = inlined_call_operand.hbm [shape: f32[1,32], index: 6, kind: output, shape index: {2}]   ;;  %s498_s7 = inlined_call_operand.hbm [shape: f32[1,32], index: 7, kind: output, shape index: {3}]   ;;  %s499_s8 = inlined_call_operand.hbm [shape: f32[1,32], index: 8, kind: output, shape index: {4}]  }
   0x1   :  { %16 = vsyncpa [#allocation5], 0 }
   0x2   :  { %17 = vsyncpa [#allocation8], 0 }
   0x3   :  { %18 = vsyncpa [#allocation11], 0  ;;  %s329_s27 = smov [#allocation3]   ;;  %s189_s9 = scalar_lea.hbm %s492_s1, 128 }
   0x4   :  { %s27_s28 = sshll.u32 %s329_s27, 4  ;;  %p190_p0 = scmp.ne.s32.totalorder %s492_s1, %s189_s9  ;;  %s28_s28 = int_to_ptr.vmem [resolvable:$true] %s27_s28 }
   0x5   :  { %p193_p1 = scmp.lt.u32.totalorder %s189_s9, %s492_s1 }
   0x7   :  { %p195_p2 = pnand %p193_p1, %p190_p0 }
   0x9   :  { %198 = shalt.err (!%p195_p2)
}
   0xa   :  { %s199_s14 = scalar_lea.vmem %s28_s28, 128  ;;  %p204_p4 = scmp.lt.s32.totalorder %s28_s28, %s28_s28 }
   0xb   :  { %p200_p3 = scmp.ne.s32.totalorder %s28_s28, %s199_s14  ;;  %p205_p5 = scmp.lt.s32.totalorder %s199_s14, %s199_s14 }
   0xd   :  { %p206_p6 = por %p205_p5, %p204_p4 }
   0xf   :  { %p207_p7 = pnand %p206_p6, %p200_p3 }
  0x11   :  { %210 = shalt.err (!%p207_p7)
}
  0x12   :  { %30 = dma.hbm_to_vmem [thread:$0]  %s492_s1, 128, %s28_s28, [#allocation4]  }
  0x13   :  { %321 = dma.done.wait [#allocation4], 128  }
  0x14   :  { %322 = vsyncadd [#allocation4], 4294967168  ;;  %vm39_vm0 = vcmask 261120   ;;  %v392_v0 = vld [vmem:[#allocation3] sm:$0xff]  ;;  %s63_s19 = ssub.f32 1.0, %s491_s0  ;;  %v61_v9 = vstv %s491_s0  ;;  %s330_s25 = smov [#allocation7]  }
  0x15   :  { %v40_v1 = vsel %vm39_vm0, %v392_v0, 0.0  ;;  %v59_v8 = vld [vmem:[%s493_s2] sm:$0x1]  ;;  %s125_s26 = sshll.u32 %s330_s25, 4  ;;  %vm91_vm1 = vcmask 253952   ;;  %s126_s26 = int_to_ptr.vmem [resolvable:$true] %s125_s26 }
  0x16   :  { %v41_v2 = vrot.slane %v40_v1, 4  ;;  %v76_v11 = vmul.f32 %v61_v9, %v59_v8  ;;  %v64_v12 = vstv %s63_s19  ;;  %s211_s2 = scalar_lea.vmem %s126_s26, 16  ;;  %s215_s27 = scalar_lea.vmem %s126_s26, 32 }
  0x17   :  { %p212_p8 = scmp.ne.s32.totalorder %s126_s26, %s211_s2  ;;  %p216_p9 = scmp.lt.s32.totalorder %s126_s26, %s126_s26 }
  0x18   :  { %v42_v3 = vadd.f32 %v41_v2, %v40_v1  ;;  %p217_p10 = scmp.lt.s32.totalorder %s215_s27, %s211_s2 }
  0x1a   :  { %v43_v4 = vrot.slane %v42_v3, 2  ;;  %p218_p11 = por %p217_p10, %p216_p9 }
  0x1c   :  { %v44_v5 = vadd.f32 %v43_v4, %v42_v3  ;;  %p219_p12 = pnand %p218_p11, %p212_p8 }
  0x1e   :  { %v45_v6 = vrot.slane %v44_v5, 1 }
  0x20   :  { %v46_v7 = vadd.f32 %v45_v6, %v44_v5 }
  0x22   :  { %v47_v10 = vmul.f32 0.125, %v46_v7 }
  0x24   :  { %v48_v13 = vsub.f32 %v392_v0, %v47_v10  ;;  %v77_v14 = vmul.f32 %v64_v12, %v47_v10  ;;  %v79_v15 = vmul.f32 0.0, %v47_v10 }
  0x26   :  { %v49_v16 = vmul.f32 %v48_v13, %v48_v13  ;;  %v78_v17 = vadd.f32 %v77_v14, %v76_v11 }
  0x28   :  { %v50_v18 = vsel %vm39_vm0, %v49_v16, 0.0  ;;  %v411_v19 = vadd.f32 %v79_v15, %v78_v17 }
  0x29   :  { %v51_v20 = vrot.slane %v50_v18, 4 }
  0x2a   :  { %92 = vst.msk [vmem:[#allocation7] sm:$0x1] %vm91_vm1, %v411_v19 }
  0x2b   :  { %v52_v21 = vadd.f32 %v51_v20, %v50_v18 }
  0x2c   :  { %222 = shalt.err (!%p219_p12)
}
  0x2d   :  { %s223_s30 = scalar_lea.hbm %s496_s5, 16 }
  0x2e   :  { %p224_p13 = scmp.ne.s32.totalorder %s496_s5, %s223_s30  ;;  %p227_p0 = scmp.lt.u32.totalorder %s223_s30, %s496_s5 }
  0x30   :  { %p229_p1 = pnand %p227_p0, %p224_p13 }
  0x32   :  { %232 = shalt.err (!%p229_p1)
}
  0x33   :  { %128 = dma.vmem_to_hbm [thread:$0]  %s126_s26, 16, %s496_s5, [#allocation8]   ;;  %v53_v22 = vrot.slane %v52_v21, 2  ;;  %v68_v24 = vsub.f32 %v47_v10, %v59_v8  ;;  %v60_v26 = vld [vmem:[%s494_s3] sm:$0x1] }
  0x34   :  { %s67_s20 = smul.f32 %s63_s19, %s491_s0  ;;  %v62_v31 = vmul.f32 %v61_v9, %v60_v26  ;;  %s331_s5 = smov [#allocation9]  }
  0x35   :  { %v54_v23 = vadd.f32 %v53_v22, %v52_v21  ;;  %v69_v28 = vmul.f32 %v68_v24, %v68_v24  ;;  %s135_s22 = sshll.u32 %s331_s5, 4  ;;  %s136_s22 = int_to_ptr.vmem [resolvable:$true] %s135_s22 }
  0x36   :  { %v70_v29 = vstv %s67_s20  ;;  %s233_s0 = scalar_lea.vmem %s136_s22, 16  ;;  %s237_s3 = scalar_lea.vmem %s136_s22, 32 }
  0x37   :  { %v55_v25 = vrot.slane %v54_v23, 1  ;;  %v71_v33 = vmul.f32 %v70_v29, %v69_v28  ;;  %p234_p2 = scmp.ne.s32.totalorder %s136_s22, %s233_s0  ;;  %p238_p3 = scmp.lt.s32.totalorder %s136_s22, %s136_s22 }
  0x38   :  { %p239_p4 = scmp.lt.s32.totalorder %s237_s3, %s233_s0 }
  0x39   :  { %v56_v27 = vadd.f32 %v55_v25, %v54_v23 }
  0x3a   :  { %p240_p5 = por %p239_p4, %p238_p3 }
  0x3b   :  { %v57_v30 = vmul.f32 0.125, %v56_v27 }
  0x3c   :  { %p241_p6 = pnand %p240_p5, %p234_p2 }
  0x3d   :  { %v65_v32 = vmul.f32 %v64_v12, %v57_v30  ;;  %v73_v35 = vmul.f32 0.0, %v57_v30 }
  0x3f   :  { %v66_v34 = vadd.f32 %v65_v32, %v62_v31 }
  0x41   :  { %v72_v36 = vadd.f32 %v71_v33, %v66_v34 }
  0x43   :  { %v74_v37 = vadd.f32 %v73_v35, %v72_v36 }
  0x45   :  { %v75_v38 = vmax.f32 %v74_v37, 0.0 }
  0x47   :  { %93 = vst.msk [vmem:[#allocation9] sm:$0x1] %vm91_vm1, %v75_v38  ;;  %185 = vrsqrt.f32 %v75_v38 }
  0x48   :  { %244 = shalt.err (!%p241_p6)
}
  0x49   :  { %s245_s24 = scalar_lea.hbm %s497_s6, 16 }
  0x4a   :  { %p246_p7 = scmp.ne.s32.totalorder %s497_s6, %s245_s24  ;;  %p249_p8 = scmp.lt.u32.totalorder %s245_s24, %s497_s6 }
  0x4c   :  { %p251_p9 = pnand %p249_p8, %p246_p7 }
  0x4e   :  { %254 = shalt.err (!%p251_p9)
}
  0x4f   :  { %138 = dma.vmem_to_hbm [thread:$0]  %s136_s22, 16, %s497_s6, [#allocation8]   ;;  %v96_v40 = vlaneseq  ;;  %vm83_vm2 = vcmp.eq.f32.partialorder %v75_v38, inf  ;;  %v86_v41 = vand.u32 2147483648, %v75_v38  ;;  %vm85_vm3 = vcmp.eq.f32.partialorder %v75_v38, 0.0 }
  0x50   :  { %s332_s30 = smov [#allocation10]  }
  0x51   :  { %v186_v39 = vpop.eup %185  ;;  %s145_s9 = sshll.u32 %s332_s30, 4  ;;  %v97_v44 = vshrl.u32 %v96_v40, 7  ;;  %s146_s9 = int_to_ptr.vmem [resolvable:$true] %s145_s9 }
  0x52   :  { %v82_v42 = vmul.f32 %v186_v39, %v75_v38  ;;  %s255_s10 = scalar_lea.vmem %s146_s9, 16  ;;  %s259_s11 = scalar_lea.vmem %s146_s9, 32 }
  0x53   :  { %p256_p10 = scmp.ne.s32.totalorder %s146_s9, %s255_s10  ;;  %p260_p11 = scmp.lt.s32.totalorder %s146_s9, %s146_s9 }
  0x54   :  { %v84_v43 = vsel %vm83_vm2, %v75_v38, %v82_v42  ;;  %p261_p12 = scmp.lt.s32.totalorder %s259_s11, %s255_s10 }
  0x55   :  { %v87_v45 = vsel %vm85_vm3, %v86_v41, %v84_v43 }
  0x56   :  { %v88_v46 = vadd.f32 1e-08, %v87_v45  ;;  %94 = vst.msk [vmem:[#allocation10] sm:$0x1] %vm91_vm1, %v87_v45  ;;  %p262_p13 = por %p261_p12, %p260_p11 }
  0x58   :  { %p263_p0 = pnand %p262_p13, %p256_p10 }
  0x5a   :  { %266 = shalt.err (!%p263_p0)
}
  0x5b   :  { %s267_s13 = scalar_lea.hbm %s498_s7, 16 }
  0x5c   :  { %p268_p1 = scmp.ne.s32.totalorder %s498_s7, %s267_s13  ;;  %p271_p2 = scmp.lt.u32.totalorder %s267_s13, %s498_s7 }
  0x5e   :  { %p273_p3 = pnand %p271_p2, %p268_p1 }
  0x60   :  { %276 = shalt.err (!%p273_p3)
}
  0x61   :  { %148 = dma.vmem_to_hbm [thread:$0]  %s146_s9, 16, %s498_s7, [#allocation11]   ;;  %187 = vrcp.f32 %v88_v46  ;;  %v98_v47 = vsub.s32 0, %v97_v44 }
  0x62   :  { %s333_s1 = smov [#allocation12]   ;;  %s334_s5 = smov [#allocation6]  }
  0x63   :  { %v99_v48 = vrot.slane %v411_v19, %v98_v47  ;;  %s155_s21 = sshll.u32 %s333_s1, 4  ;;  %s115_s22 = sshll.u32 %s334_s5, 4  ;;  %s156_s21 = int_to_ptr.vmem [resolvable:$true] %s155_s21  ;;  %s116_s22 = int_to_ptr.vmem [resolvable:$true] %s115_s22 }
  0x64   :  { %s277_s0 = scalar_lea.vmem %s156_s21, 16  ;;  %s281_s3 = scalar_lea.vmem %s156_s21, 32 }
  0x65   :  { %v100_v49 = vsub.f32 %v392_v0, %v99_v48  ;;  %p278_p4 = scmp.ne.s32.totalorder %s156_s21, %s277_s0  ;;  %p282_p5 = scmp.lt.s32.totalorder %s156_s21, %s156_s21 }
  0x66   :  { %p283_p6 = scmp.lt.s32.totalorder %s281_s3, %s277_s0 }
  0x68   :  { %p284_p7 = por %p283_p6, %p282_p5 }
  0x6a   :  { %p285_p8 = pnand %p284_p7, %p278_p4 }
  0x6b   :  { %v188_v50 = vpop.eup %187 }
  0x6c   :  { %95 = vst.msk [vmem:[#allocation12] sm:$0x1] %vm91_vm1, %v188_v50  ;;  %v104_v51 = vrot.slane %v188_v50, %v98_v47 }
  0x6d   :  { %288 = shalt.err (!%p285_p8)
}
  0x6e   :  { %s289_s23 = scalar_lea.hbm %s499_s8, 16 }
  0x6f   :  { %p290_p9 = scmp.ne.s32.totalorder %s499_s8, %s289_s23  ;;  %p293_p10 = scmp.lt.u32.totalorder %s289_s23, %s499_s8 }
  0x71   :  { %p295_p11 = pnand %p293_p10, %p290_p9 }
  0x73   :  { %298 = shalt.err (!%p295_p11)
}
  0x74   :  { %158 = dma.vmem_to_hbm [thread:$0]  %s156_s21, 16, %s499_s8, [#allocation11]   ;;  %v105_v52 = vmul.f32 %v104_v51, %v100_v49 }
  0x75   :  { %s299_s29 = scalar_lea.vmem %s116_s22, 128  ;;  %p304_p13 = scmp.lt.s32.totalorder %s116_s22, %s116_s22 }
  0x76   :  { %v178_v53 = vclamps-f32 %v105_v52, 5.0  ;;  %p300_p12 = scmp.ne.s32.totalorder %s116_s22, %s299_s29  ;;  %p305_p0 = scmp.lt.s32.totalorder %s299_s29, %s299_s29 }
  0x78   :  { %108 = vst.msk [vmem:[#allocation6] sm:$0xff] %vm39_vm0, %v178_v53  ;;  %p306_p1 = por %p305_p0, %p304_p13 }
  0x7a   :  { %p307_p2 = pnand %p306_p1, %p300_p12 }
  0x7c   :  { %310 = shalt.err (!%p307_p2)
}
  0x7d   :  { %s311_s10 = scalar_lea.hbm %s495_s4, 128 }
  0x7e   :  { %p312_p3 = scmp.ne.s32.totalorder %s495_s4, %s311_s10  ;;  %p315_p4 = scmp.lt.u32.totalorder %s311_s10, %s495_s4 }
  0x80   :  { %p317_p5 = pnand %p315_p4, %p312_p3 }
  0x82   :  { %320 = shalt.err (!%p317_p5)
}
  0x83   :  { %118 = dma.vmem_to_hbm [thread:$0]  %s116_s22, 128, %s495_s4, [#allocation5]  }
  0x84   :  { %323 = dma.done.wait [#allocation5], 128  }
  0x85   :  { %324 = vsyncadd [#allocation5], 4294967168 }
  0x86   :  { %325 = dma.done.wait [#allocation8], 32  }
  0x87   :  { %326 = vsyncadd [#allocation8], 4294967264 }
  0x88   :  { %327 = dma.done.wait [#allocation11], 32  }
  0x89   :  { %328 = vsyncadd [#allocation11], 4294967264 }
  0x8a   :  { %174 = vsyncpa [#allocation4], 1 }
  0x8b   :  { %175 = vsyncpa [#allocation5], 1 }
  0x8c   :  { %176 = vsyncpa [#allocation8], 1 }
  0x8d   :  { %177 = vsyncpa [#allocation11], 1 }

</bundles_post_ra>
